<compile_context>
chip_gen: v7x
topology: tpu7x:2x2x1
jax: 0.10.0
libtpu: 0.0.40
codegen_flags: <defaults>
</compile_context>

<pallas_src>
import jax
import jax.numpy as jnp
from jax.experimental import pallas as pl
from jax.experimental.pallas import tpu as pltpu

LANE = 128


def _round_up(x, m):
    return (x + m - 1) // m * m


def prepare_table(table):
    """One-time (init) padding of the (V, V) embedding table to (v_pad, v_pad).

    Padded rows are 0 (never selected by the one-hot gather); padded columns are
    -1e30, which bakes the vocab mask into the logits for max/logsumexp.
    """
    V = table.shape[0]
    v_pad = _round_up(V, LANE)
    t = table.astype(jnp.float32)
    t = jnp.pad(t, ((0, v_pad - V), (0, 0)))                       # rows: 0
    t = jnp.pad(t, ((0, 0), (0, v_pad - V)), constant_values=-1e30)  # cols: -1e30
    return t


def _make_kernel(n_valid, tile_n, v_pad):
    # n_valid / tile_n / v_pad are Python ints (compile-time constants) — nothing
    # array-valued is closed over, so the kernel captures no constants.

    def kernel(it_ref, table_ref, logits_ref, partial_ref):
        pid = pl.program_id(0)

        it = it_ref[...]                       # (tile_n, 2) int32: [:,0]=idx, [:,1]=target
        idx = it[:, 0:1]                       # (tile_n, 1)
        tgt = it[:, 1:2]                       # (tile_n, 1)
        table = table_ref[...]                 # (v_pad, v_pad) f32, resident across grid

        col = jax.lax.broadcasted_iota(jnp.int32, (tile_n, v_pad), 1)

        # Embedding lookup as a one-hot matmul on the MXU: logits[i, :] = table[idx[i], :].
        # HIGHEST precision keeps the f32 table values exact through the MXU.
        onehot = (col == idx).astype(jnp.float32)                  # (tile_n, v_pad)
        logits = jnp.dot(onehot, table,
                         preferred_element_type=jnp.float32,
                         precision=jax.lax.Precision.HIGHEST)      # (tile_n, v_pad)
        logits_ref[...] = logits                                   # lane-dense store

        # Padded vocab columns already hold -1e30 (baked into the table), so logits go
        # straight into a numerically stable log-softmax (exp underflows to 0 there).
        m = jnp.max(logits, axis=-1, keepdims=True)                # (tile_n, 1)
        lse = m + jnp.log(jnp.sum(jnp.exp(logits - m), axis=-1, keepdims=True))

        # Target-logit gather via select + reduce (no second one-hot materialization).
        tgt_logit = jnp.sum(jnp.where(col == tgt, logits, 0.0),
                            axis=-1, keepdims=True)                # (tile_n, 1)

        # Rows beyond the true token count contribute 0 to the loss sum.
        row = pid * tile_n + jax.lax.broadcasted_iota(jnp.int32, (tile_n, 1), 0)
        per_row = jnp.where(row < n_valid, lse - tgt_logit, 0.0)   # (tile_n, 1)

        # Per-tile partial loss sum, written every grid step (lane-dense 128-wide block)
        # -> keeps the row axis "parallel"; the wrapper reduces across tiles and divides.
        ps = jnp.sum(per_row, axis=0, keepdims=True)               # (1, 1)
        partial_ref[...] = jnp.broadcast_to(ps.reshape(1, 1, 1), (1, 1, 128))

    return kernel


def bigram_forward(idx, targets, table_p, vocab_size, *, tile_n=2048,
                   return_padded=False):
    """idx, targets: (B, T) int; table_p: padded (v_pad, v_pad) f32 from prepare_table.

    Returns (logits of shape (B*T, vocab_size), scalar mean cross-entropy loss),
    matching PyTorch BigramLanguageModel.forward. With return_padded=True the raw
    (n_pad, v_pad) logits slab is returned instead (lets downstream ops skip the
    re-copying slice).
    """
    B, T = idx.shape
    N = B * T
    v_pad = table_p.shape[0]

    # Row tile: multiple of 8 (f32 sublanes), no larger than the (padded) token count.
    tile_n = max(8, min(_round_up(tile_n, 8), _round_up(N, 8)))
    n_pad = _round_up(N, tile_n)
    num_tiles = n_pad // tile_n

    # Pack idx/targets into one (n_pad, 2) int32 input (one DMA stream); padded rows
    # use index 0 and are masked out of the loss inside the kernel.
    it = jnp.stack([idx.reshape(N), targets.reshape(N)], axis=1).astype(jnp.int32)
    if n_pad != N:
        it = jnp.pad(it, ((0, n_pad - N), (0, 0)))

    kernel = _make_kernel(N, tile_n, v_pad)

    logits_p, partials = pl.pallas_call(
        kernel,
        out_shape=(
            jax.ShapeDtypeStruct((n_pad, v_pad), jnp.float32),
            jax.ShapeDtypeStruct((num_tiles, 1, 128), jnp.float32),
        ),
        grid=(num_tiles,),
        in_specs=[
            pl.BlockSpec((tile_n, 2), lambda i: (i, 0)),       # packed idx/targets
            pl.BlockSpec((v_pad, v_pad), lambda i: (0, 0)),    # resident padded table
        ],
        out_specs=(
            pl.BlockSpec((tile_n, v_pad), lambda i: (i, 0)),   # lane-dense logits tile
            pl.BlockSpec((1, 1, 128), lambda i: (i, 0, 0)),    # per-tile partial loss
        ),
        compiler_params=pltpu.CompilerParams(
            dimension_semantics=("parallel",),                 # independent row tiles
            vmem_limit_bytes=48 * 1024 * 1024,                 # room for 2k-4k row tiles
        ),
    )(it, table_p)

    loss = jnp.sum(partials[:, 0, 0]) * (1.0 / N)

    if return_padded:
        return logits_p, loss
    # NOTE: this slice re-reads/re-writes the dominant tensor; fuse downstream consumers
    # onto the padded slab (return_padded=True) when chasing end-to-end HBM traffic.
    return logits_p[:N, :vocab_size], loss


def _reference(idx, targets, table):
    """Plain-JAX reference mirroring the PyTorch forward."""
    B, T = idx.shape
    logits = table[idx]                      # (B, T, C) embedding lookup
    C = logits.shape[-1]
    logits = logits.reshape(B * T, C)
    tgt = targets.reshape(B * T)
    lse = jax.scipy.special.logsumexp(logits, axis=-1)
    tgt_logit = jnp.take_along_axis(logits, tgt[:, None], axis=-1)[:, 0]
    loss = jnp.mean(lse - tgt_logit)
    return logits, loss


if __name__ == "__main__":
    key = jax.random.PRNGKey(0)
    k_tab, k_idx, k_tgt = jax.random.split(key, 3)

    vocab_size = 65          # e.g. tiny-shakespeare alphabet size
    B, T = 2, 8

    # nn.Embedding default init: N(0, 1)
    table = jax.random.normal(k_tab, (vocab_size, vocab_size), dtype=jnp.float32)
    idx = jax.random.randint(k_idx, (B, T), 0, vocab_size, dtype=jnp.int32)
    targets = jax.random.randint(k_tgt, (B, T), 0, vocab_size, dtype=jnp.int32)

    table_p = prepare_table(table)           # hoisted, one-time padding (init path)

    logits, loss = bigram_forward(idx, targets, table_p, vocab_size)
    jax.block_until_ready((logits, loss))

    ref_logits, ref_loss = _reference(idx, targets, table)
    assert logits.shape == (B * T, vocab_size)
    assert jnp.allclose(logits, ref_logits, atol=1e-5), "logits mismatch"
    assert jnp.allclose(loss, ref_loss, atol=1e-5), "loss mismatch"

    print("KERNEL_OK")
</pallas_src>

<mosaic_0001>
module attributes {stable_mosaic.version = 11 : i64} {
  func.func @kernel(%arg0: i32, %arg1: memref<16x2xi32, #tpu.memory_space<vmem>>, %arg2: memref<128x128xf32, #tpu.memory_space<vmem>>, %arg3: memref<16x128xf32, #tpu.memory_space<vmem>>, %arg4: memref<1x1x128xf32, #tpu.memory_space<vmem>>) attributes {dimension_semantics = [#tpu.dimension_semantics<parallel>], iteration_bounds = array<i64: 1>, scalar_prefetch = 0 : i64, scratch_operands = 0 : i64, tpu.core_type = #tpu.core_type<tc>, window_params = [{transform_indices = @transform_0, window_bounds = array<i64: 16, 2>}, {pipeline_mode = #tpu.pipeline_mode<synchronous>, transform_indices = @transform_1, window_bounds = array<i64: 128, 128>}, {transform_indices = @transform_2, window_bounds = array<i64: 16, 128>}, {transform_indices = @transform_3, window_bounds = array<i64: 1, 1, 128>}]} {
    %c0 = arith.constant 0 : index
    %c0_0 = arith.constant 0 : index
    %0 = vector.load %arg1[%c0, %c0_0] : memref<16x2xi32, #tpu.memory_space<vmem>>, vector<16x2xi32>
    %1 = vector.extract_strided_slice %0 {offsets = [0, 0], sizes = [16, 1], strides = [1, 1]} : vector<16x2xi32> to vector<16x1xi32>
    %2 = vector.extract_strided_slice %0 {offsets = [0, 1], sizes = [16, 1], strides = [1, 1]} : vector<16x2xi32> to vector<16x1xi32>
    %c0_1 = arith.constant 0 : index
    %c0_2 = arith.constant 0 : index
    %3 = vector.load %arg2[%c0_1, %c0_2] : memref<128x128xf32, #tpu.memory_space<vmem>>, vector<128x128xf32>
    %4 = tpu.iota {dimensions = array<i32: 1>} : vector<16x128xi32>
    %5 = vector.broadcast %1 : vector<16x1xi32> to vector<16x128xi32>
    %6 = arith.cmpi eq, %4, %5 : vector<16x128xi32>
    %7 = arith.extui %6 : vector<16x128xi1> to vector<16x128xi32>
    %8 = arith.sitofp %7 : vector<16x128xi32> to vector<16x128xf32>
    %cst = arith.constant dense<0.000000e+00> : vector<16x128xf32>
    %9 = tpu.matmul %8, %3, %cst {dimension_numbers = #tpu.dot_dimension_numbers<[1], [0], [0], [1], [0, 0, 1, 1], [], []>, precision = #tpu.contract_precision<fp32>} : vector<16x128xf32>, vector<128x128xf32>, vector<16x128xf32> -> vector<16x128xf32>
    %c0_3 = arith.constant 0 : index
    %c0_4 = arith.constant 0 : index
    %10 = vector.load %arg3[%c0_3, %c0_4] : memref<16x128xf32, #tpu.memory_space<vmem>>, vector<16x128xf32>
    tpu.vector_store %arg3[%c0_3, %c0_4], %9 {strides = array<i32>} : memref<16x128xf32, #tpu.memory_space<vmem>>, vector<16x128xf32>,
    %cst_5 = arith.constant dense<0xFF800000> : vector<16xf32>
    %11 = vector.multi_reduction <maximumf>, %9, %cst_5 [1] : vector<16x128xf32> to vector<16xf32>
    %12 = vector.shape_cast %11 : vector<16xf32> to vector<16x1xf32>
    %13 = vector.broadcast %12 : vector<16x1xf32> to vector<16x128xf32>
    %14 = arith.subf %9, %13 : vector<16x128xf32>
    %15 = math.exp %14 : vector<16x128xf32>
    %cst_6 = arith.constant dense<0.000000e+00> : vector<16xf32>
    %16 = vector.multi_reduction <add>, %15, %cst_6 [1] : vector<16x128xf32> to vector<16xf32>
    %17 = vector.shape_cast %16 : vector<16xf32> to vector<16x1xf32>
    %18 = math.log %17 : vector<16x1xf32>
    %19 = arith.addf %12, %18 : vector<16x1xf32>
    %20 = vector.broadcast %2 : vector<16x1xi32> to vector<16x128xi32>
    %21 = arith.cmpi eq, %4, %20 : vector<16x128xi32>
    %cst_7 = arith.constant 0.000000e+00 : f32
    %22 = vector.broadcast %cst_7 : f32 to vector<16x128xf32>
    %23 = arith.select %21, %9, %22 : vector<16x128xi1>, vector<16x128xf32>
    %cst_8 = arith.constant dense<0.000000e+00> : vector<16xf32>
    %24 = vector.multi_reduction <add>, %23, %cst_8 [1] : vector<16x128xf32> to vector<16xf32>
    %25 = vector.shape_cast %24 : vector<16xf32> to vector<16x1xf32>
    %c16_i32 = arith.constant 16 : i32
    %26 = arith.muli %arg0, %c16_i32 : i32
    %27 = tpu.iota {dimensions = array<i32: 0>} : vector<16x1xi32>
    %28 = vector.broadcast %26 : i32 to vector<16x1xi32>
    %29 = arith.addi %28, %27 : vector<16x1xi32>
    %c16_i32_9 = arith.constant 16 : i32
    %30 = vector.broadcast %c16_i32_9 : i32 to vector<16x1xi32>
    %31 = arith.cmpi slt, %29, %30 : vector<16x1xi32>
    %32 = arith.subf %19, %25 : vector<16x1xf32>
    %cst_10 = arith.constant 0.000000e+00 : f32
    %33 = vector.broadcast %cst_10 : f32 to vector<16x1xf32>
    %34 = arith.select %31, %32, %33 : vector<16x1xi1>, vector<16x1xf32>
    %cst_11 = arith.constant dense<0.000000e+00> : vector<1xf32>
    %35 = vector.multi_reduction <add>, %34, %cst_11 [0] : vector<16x1xf32> to vector<1xf32>
    %36 = vector.shape_cast %35 : vector<1xf32> to vector<1x1xf32>
    %37 = vector.shape_cast %36 : vector<1x1xf32> to vector<1x1x1xf32>
    %38 = vector.shape_cast %37 : vector<1x1x1xf32> to vector<1x1x1xf32>
    %39 = vector.broadcast %38 : vector<1x1x1xf32> to vector<1x1x128xf32>
    %c0_12 = arith.constant 0 : index
    %c0_13 = arith.constant 0 : index
    %c0_14 = arith.constant 0 : index
    %40 = vector.load %arg4[%c0_12, %c0_13, %c0_14] : memref<1x1x128xf32, #tpu.memory_space<vmem>>, vector<1x1x128xf32>
    tpu.vector_store %arg4[%c0_12, %c0_13, %c0_14], %39 {strides = array<i32>} : memref<1x1x128xf32, #tpu.memory_space<vmem>>, vector<1x1x128xf32>,
    return
  }
  func.func @transform_0(%arg0: i32) -> (i32, i32) {
    %c0_i32 = arith.constant 0 : i32
    %c0_i32_0 = arith.constant 0 : i32
    return %arg0, %c0_i32 : i32, i32
  }
  func.func @transform_1(%arg0: i32) -> (i32, i32) {
    %c0_i32 = arith.constant 0 : i32
    %c0_i32_0 = arith.constant 0 : i32
    %c0_i32_1 = arith.constant 0 : i32
    return %c0_i32, %c0_i32_0 : i32, i32
  }
  func.func @transform_2(%arg0: i32) -> (i32, i32) {
    %c0_i32 = arith.constant 0 : i32
    %c0_i32_0 = arith.constant 0 : i32
    return %arg0, %c0_i32 : i32, i32
  }
  func.func @transform_3(%arg0: i32) -> (i32, i32, i32) {
    %c0_i32 = arith.constant 0 : i32
    %c0_i32_0 = arith.constant 0 : i32
    %c0_i32_1 = arith.constant 0 : i32
    return %arg0, %c0_i32, %c0_i32_0 : i32, i32, i32
  }
}

</mosaic_0001>

<bundles_post_ra>
// kernel: tpu_custom_call.1
= control target key start
LH: loop header
LB: loop body
LE: loop exit
PB: predicated region body
PF: predicated region fallthrough
CT: control target
= control target key end

     0   :  { %9 = vsyncpa [#allocation3], 0  ;;  %s1800_s0 = inlined_call_operand.vmem [shape: s32[16,2], index: 0, kind: input, shape index: {}]   ;;  %s1801_s1 = inlined_call_operand.hbm [shape: f32[128,128], index: 1, kind: input, shape index: {}]   ;;  %s1802_s2 = inlined_call_operand.hbm [shape: f32[16,128], index: 2, kind: output, shape index: {0}]   ;;  %s1803_s3 = inlined_call_operand.hbm [shape: f32[1,1,128], index: 3, kind: output, shape index: {1}]  }
   0x1   :  { %10 = vsyncpa [#allocation4], 0 }
   0x2   :  { %11 = vsyncpa [#allocation7], 0  ;;  %s1453_s12 = smov [#allocation2]   ;;  %s1381_s16 = scalar_lea.hbm %s1801_s1, 2048 }
   0x3   :  { %s19_s13 = sshll.u32 %s1453_s12, 4  ;;  %p1382_p0 = scmp.ne.s32.totalorder %s1801_s1, %s1381_s16  ;;  %s20_s13 = int_to_ptr.vmem [resolvable:$true] %s19_s13 }
   0x4   :  { %p1385_p1 = scmp.lt.u32.totalorder %s1381_s16, %s1801_s1 }
   0x6   :  { %p1387_p2 = pnand %p1385_p1, %p1382_p0 }
   0x8   :  { %1390 = shalt.err (!%p1387_p2)
}
   0x9   :  { %s1391_s21 = scalar_lea.vmem %s20_s13, 2048  ;;  %p1396_p4 = scmp.lt.s32.totalorder %s20_s13, %s20_s13 }
   0xa   :  { %p1392_p3 = scmp.ne.s32.totalorder %s20_s13, %s1391_s21  ;;  %p1397_p5 = scmp.lt.s32.totalorder %s1391_s21, %s1391_s21 }
   0xc   :  { %p1398_p6 = por %p1397_p5, %p1396_p4 }
   0xe   :  { %p1399_p7 = pnand %p1398_p6, %p1392_p3 }
  0x10   :  { %1402 = shalt.err (!%p1399_p7)
}
  0x11   :  { %s1454_s22 = smov 128   ;;  %s1455_s23 = smov 8  }
  0x12   :  { %25 = dma.hbm_to_vmem [thread:$0]  %s1801_s1, 2048, %s20_s13, [#allocation3], %s1454_s22, %s1454_s22, %s1455_s23  }
  0x13   :  { %1447 = dma.done.wait [#allocation3], 2048  }
  0x14   :  { %1448 = vsyncadd [#allocation3], 4294965248  ;;  %v1456_v0 = vmov 0   ;;  %v1500_v1 = vld [vmem:[%s1800_s0] sm:$0xff]  ;;  %v32_v3 = vld [vmem:[#allocation2 + $0x8] sm:$0xff] }
  0x15   :  { %1370 = vset.pattern.permute.xlu0 %v1456_v0  ;;  %v31_v2 = vld [vmem:[#allocation2] sm:$0xff]  ;;  %v33_v5 = vld [vmem:[#allocation2 + $0x10] sm:$0xff]  ;;  %v34_v6 = vld [vmem:[#allocation2 + $0x18] sm:$0xff]  ;;  %v65_v8 = vand.u32 4294901760, %v32_v3 }
  0x16   :  { %50 = vperm.xlu0 %1370, %v1500_v1   ;;  %v62_v4 = vand.u32 4294901760, %v31_v2  ;;  %v1506_v7 = vld [vmem:[%s1800_s0 + $0x8] sm:$0xff]  ;;  %v68_v9 = vand.u32 4294901760, %v33_v5  ;;  %v71_v10 = vand.u32 4294901760, %v34_v6  ;;  %v35_v11 = vld [vmem:[#allocation2 + $0x20] sm:$0xff]  ;;  %v37_v17 = vld [vmem:[#allocation2 + $0x30] sm:$0xff] }
  0x17   :  { %v36_v12 = vld [vmem:[#allocation2 + $0x28] sm:$0xff]  ;;  %v74_v15 = vand.u32 4294901760, %v35_v11  ;;  %v38_v18 = vld [vmem:[#allocation2 + $0x38] sm:$0xff]  ;;  %v80_v20 = vand.u32 4294901760, %v37_v17  ;;  %v39_v22 = vld [vmem:[#allocation2 + $0x40] sm:$0xff]  ;;  %v1559_v46 = vsub.f32 %v32_v3, %v65_v8  ;;  %s1460_s0 = smov [#allocation5]  }
  0x18   :  { %v1508_v13 = vpack.c.bf16 %v65_v8, %v62_v4  ;;  %v1510_v14 = vpack.c.bf16 %v71_v10, %v68_v9  ;;  %v77_v16 = vand.u32 4294901760, %v36_v12  ;;  %v83_v21 = vand.u32 4294901760, %v38_v18  ;;  %v40_v23 = vld [vmem:[#allocation2 + $0x48] sm:$0xff]  ;;  %v1527_v28 = vld [vmem:[#allocation2 + $0x50] sm:$0xff]  ;;  %v1535_v32 = vld [vmem:[#allocation2 + $0x58] sm:$0xff]  ;;  %s807_s1 = sshll.u32 %s1460_s0, 4  ;;  %s808_s1 = int_to_ptr.vmem [resolvable:$true] %s807_s1 }
  0x19   :  { %v1521_v24 = vsub.f32 %v33_v5, %v68_v9  ;;  %v1523_v25 = vsub.f32 %v34_v6, %v71_v10  ;;  %v86_v26 = vand.u32 4294901760, %v39_v22  ;;  %v89_v27 = vand.u32 4294901760, %v40_v23  ;;  %v1551_v41 = vld [vmem:[#allocation2 + $0x60] sm:$0xff]  ;;  %v1555_v44 = vld [vmem:[#allocation2 + $0x68] sm:$0xff]  ;;  %v1579_v58 = vld [vmem:[#allocation2 + $0x70] sm:$0xff]  ;;  %s1403_s30 = scalar_lea.vmem %s808_s1, 256  ;;  %p1408_p9 = scmp.lt.s32.totalorder %s808_s1, %s808_s1 }
  0x1a   :  { %53 = vperm.xlu0 %1370, %v1506_v7   ;;  %1256 = vmatprep.subr.bf16.mxu0 %v1508_v13  ;;  %v1519_v19 = vpack.c.bf16 %v77_v16, %v74_v15  ;;  %v1533_v31 = vpack.c.bf16 %v83_v21, %v80_v20  ;;  %v92_v36 = vand.u32 4294901760, %v1527_v28  ;;  %v1542_v37 = vsub.f32 %v35_v11, %v74_v15  ;;  %v46_v61 = vld [vmem:[#allocation2 + $0x78] sm:$0xff]  ;;  %p1404_p8 = scmp.ne.s32.totalorder %s808_s1, %s1403_s30  ;;  %p1409_p10 = scmp.lt.s32.totalorder %s1403_s30, %s1403_s30 }
  0x1b   :  { %1160 = vmatprep.subr.bf16.mxu1 %v1508_v13  ;;  %1258 = vmatpush3.bf16.msra.mxu0 %v1508_v13  ;;  %v179_v29 = vand.u32 4294901760, %v1521_v24  ;;  %v186_v30 = vand.u32 4294901760, %v1523_v25  ;;  %v1544_v38 = vsub.f32 %v36_v12, %v77_v16  ;;  %v1548_v39 = vpack.c.bf16 %v89_v27, %v86_v26 }
  0x1c   :  { %1162 = vmatpush3.bf16.msra.mxu1 %v1508_v13  ;;  %1260 = vmatprep.subr.bf16.mxu0 %v1510_v14  ;;  %v95_v40 = vand.u32 4294901760, %v1535_v32  ;;  %v1557_v45 = vsub.f32 %v31_v2, %v62_v4  ;;  %v193_v47 = vand.u32 4294901760, %v1542_v37  ;;  %v1565_v50 = vsub.f32 %v37_v17, %v80_v20  ;;  %p1410_p11 = por %p1409_p10, %p1408_p9 }
  0x1d   :  { %1164 = vmatprep.subr.bf16.mxu1 %v1510_v14  ;;  %v1537_v33 = vpack.c.bf16 %v186_v30, %v179_v29  ;;  %v180_v34 = vsub.f32 %v1521_v24, %v179_v29  ;;  %v187_v35 = vsub.f32 %v1523_v25, %v186_v30  ;;  %v200_v48 = vand.u32 4294901760, %v1544_v38 }
  0x1e   :  { %v1567_v51 = vsub.f32 %v38_v18, %v83_v21  ;;  %v98_v52 = vand.u32 4294901760, %v1551_v41  ;;  %v194_v54 = vsub.f32 %v1542_v37, %v193_v47  ;;  %v1576_v56 = vpack.c.bf16 %v95_v40, %v92_v36  ;;  %p1411_p12 = pnand %p1410_p11, %p1404_p8 }
  0x1f   :  { %1262 = vmatpush3.bf16.msra.mxu0 %v1510_v14  ;;  %v181_v42 = vand.u32 4294901760, %v180_v34  ;;  %v188_v43 = vand.u32 4294901760, %v187_v35  ;;  %v1570_v53 = vpack.c.bf16 %v200_v48, %v193_v47  ;;  %v201_v55 = vsub.f32 %v1544_v38, %v200_v48 }
  0x20   :  { %1166 = vmatpush3.bf16.msra.mxu1 %v1510_v14  ;;  %1264 = vmatprep.subr.bf16.mxu0 %v1519_v19  ;;  %v101_v57 = vand.u32 4294901760, %v1555_v44  ;;  %v207_v59 = vand.u32 4294901760, %v1565_v50  ;;  %v214_v60 = vand.u32 4294901760, %v1567_v51  ;;  %v165_v62 = vand.u32 4294901760, %v1557_v45 }
  0x21   :  { %1168 = vmatprep.subr.bf16.mxu1 %v1519_v19  ;;  %v1563_v49 = vpack.c.bf16 %v188_v43, %v181_v42  ;;  %v172_v63 = vand.u32 4294901760, %v1559_v46  ;;  %v195_v0 = vand.u32 4294901760, %v194_v54  ;;  %v202_v2 = vand.u32 4294901760, %v201_v55 }
  0x22   :  { %v1587_v3 = vpack.c.bf16 %v214_v60, %v207_v59  ;;  %v208_v4 = vsub.f32 %v1565_v50, %v207_v59  ;;  %v215_v5 = vsub.f32 %v1567_v51, %v214_v60  ;;  %v1591_v6 = vsub.f32 %v39_v22, %v86_v26 }
  0x23   :  { %1266 = vmatpush3.bf16.msra.mxu0 %v1519_v19  ;;  %v104_v8 = vand.u32 4294901760, %v1579_v58  ;;  %v1594_v9 = vpack.c.bf16 %v202_v2, %v195_v0  ;;  %v1596_v10 = vsub.f32 %v40_v23, %v89_v27  ;;  %v107_v11 = vand.u32 4294901760, %v46_v61 }
  0x24   :  { %1170 = vmatpush3.bf16.msra.mxu1 %v1519_v19  ;;  %1268 = vmatprep.subr.bf16.mxu0 %v1533_v31  ;;  %v209_v12 = vand.u32 4294901760, %v208_v4  ;;  %v216_v15 = vand.u32 4294901760, %v215_v5  ;;  %v221_v16 = vand.u32 4294901760, %v1591_v6  ;;  %v1603_v17 = vpack.c.bf16 %v101_v57, %v98_v52 }
  0x25   :  { %1172 = vmatprep.subr.bf16.mxu1 %v1533_v31  ;;  %v166_v18 = vsub.f32 %v1557_v45, %v165_v62  ;;  %v173_v20 = vsub.f32 %v1559_v46, %v172_v63  ;;  %v228_v21 = vand.u32 4294901760, %v1596_v10  ;;  %v234_v26 = vsub.f32 %v1527_v28, %v92_v36 }
  0x26   :  { %v1608_v22 = vpack.c.bf16 %v216_v15, %v209_v12  ;;  %v222_v23 = vsub.f32 %v1591_v6, %v221_v16  ;;  %v241_v27 = vsub.f32 %v1535_v32, %v95_v40  ;;  %v1620_v43 = vpack.c.bf16 %v107_v11, %v104_v8 }
  0x27   :  { %1270 = vmatpush3.bf16.msra.mxu0 %v1533_v31  ;;  %v1613_v29 = vpack.c.bf16 %v228_v21, %v221_v16  ;;  %v229_v30 = vsub.f32 %v1596_v10, %v228_v21  ;;  %v235_v35 = vand.u32 4294901760, %v234_v26  ;;  %v167_v28 = vand.u32 4294901760, %v166_v18 }
  0x28   :  { %1174 = vmatpush3.bf16.msra.mxu1 %v1533_v31  ;;  %1272 = vmatprep.subr.bf16.mxu0 %v1548_v39  ;;  %v223_v34 = vand.u32 4294901760, %v222_v23  ;;  %v242_v42 = vand.u32 4294901760, %v241_v27  ;;  %v174_v36 = vand.u32 4294901760, %v173_v20  ;;  %v248_v54 = vsub.f32 %v1551_v41, %v98_v52 }
  0x29   :  { %1176 = vmatprep.subr.bf16.mxu1 %v1548_v39  ;;  %v230_v32 = vand.u32 4294901760, %v229_v30  ;;  %v236_v47 = vsub.f32 %v234_v26, %v235_v35  ;;  %v255_v59 = vsub.f32 %v1555_v44, %v101_v57  ;;  %v1287_v4 = vpack.c.bf16 %v172_v63, %v165_v62 }
  0x2a   :  { %v1622_v40 = vpack.c.bf16 %v242_v42, %v235_v35  ;;  %v243_v48 = vsub.f32 %v241_v27, %v242_v42  ;;  %v249_v2 = vand.u32 4294901760, %v248_v54  ;;  %v1191_v5 = vpack.c.bf16 %v174_v36, %v167_v28 }
  0x2b   :  { %1274 = vmatpush3.bf16.msra.mxu0 %v1548_v39  ;;  %v1625_v55 = vpack.c.bf16 %v230_v32, %v223_v34  ;;  %v237_v60 = vand.u32 4294901760, %v236_v47  ;;  %v256_v12 = vand.u32 4294901760, %v255_v59  ;;  %v262_v52 = vsub.f32 %v1579_v58, %v104_v8 }
  0x2c   :  { %1178 = vmatpush3.bf16.msra.mxu1 %v1548_v39  ;;  %1276 = vmatprep.subr.bf16.mxu0 %v1576_v56  ;;  %v244_v0 = vand.u32 4294901760, %v243_v48  ;;  %v250_v41 = vsub.f32 %v248_v54, %v249_v2  ;;  %v269_v44 = vsub.f32 %v46_v61, %v107_v11  ;;  %v1647_v11 = vpack.c.bf16 %v1559_v46, %v1557_v45 }
  0x2d   :  { %1180 = vmatprep.subr.bf16.mxu1 %v1576_v56  ;;  %v1635_v57 = vpack.c.bf16 %v256_v12, %v249_v2  ;;  %v257_v16 = vsub.f32 %v255_v59, %v256_v12  ;;  %v263_v20 = vand.u32 4294901760, %v262_v52  ;;  %v1651_v35 = vpack.c.bf16 %v1523_v25, %v1521_v24 }
  0x2e   :  { %v1632_v15 = vpack.c.bf16 %v244_v0, %v237_v60  ;;  %v251_v18 = vand.u32 4294901760, %v250_v41  ;;  %v270_v21 = vand.u32 4294901760, %v269_v44  ;;  %v1655_v42 = vpack.c.bf16 %v1544_v38, %v1542_v37 }
  0x2f   :  { %1278 = vmatpush3.bf16.msra.mxu0 %v1576_v56  ;;  %v258_v62 = vand.u32 4294901760, %v257_v16  ;;  %v264_v23 = vsub.f32 %v262_v52, %v263_v20  ;;  %v1659_v28 = vpack.c.bf16 %v1567_v51, %v1565_v50  ;;  %v1663_v36 = vpack.c.bf16 %v1596_v10, %v1591_v6 }
  0x30   :  { %1182 = vmatpush3.bf16.msra.mxu1 %v1576_v56  ;;  %1280 = vmatprep.subr.bf16.mxu0 %v1603_v17  ;;  %v1639_v63 = vpack.c.bf16 %v270_v21, %v263_v20  ;;  %v271_v30 = vsub.f32 %v269_v44, %v270_v21  ;;  %v1665_v32 = vpack.c.bf16 %v241_v27, %v234_v26  ;;  %v1457_v24 = vmov 1  }
  0x31   :  { %1184 = vmatprep.subr.bf16.mxu1 %v1603_v17  ;;  %v1641_v34 = vpack.c.bf16 %v258_v62, %v251_v18  ;;  %v265_v58 = vand.u32 4294901760, %v264_v23  ;;  %v1667_v45 = vpack.c.bf16 %v255_v59, %v248_v54  ;;  %v1669_v46 = vpack.c.bf16 %v269_v44, %v262_v52  ;;  %1371 = vset.pattern.permute.xlu0 %v1457_v24 }
  0x32   :  { %v272_v61 = vand.u32 4294901760, %v271_v30  ;;  %1372 = vset.pattern.permute.xlu1 %v1457_v24  ;;  %768 = vperm.xlu0 %1371, %v1500_v1   ;;  %v47_v25 = vlaneseq  ;;  %v1458_v50 = vmov 0.0   ;;  %v1459_v60 = vmov 1.0  }
  0x33   :  { %1282 = vmatpush3.bf16.msra.mxu0 %v1603_v17 }
  0x34   :  { %1186 = vmatpush3.bf16.msra.mxu1 %v1603_v17  ;;  %1284 = vmatprep.subr.bf16.mxu0 %v1620_v43  ;;  %v1643_v8 = vpack.c.bf16 %v272_v61, %v265_v58  ;;  %v1672_v37 = vand.u32 127, %v47_v25 }
  0x35   :  { %1188 = vmatprep.subr.bf16.mxu1 %v1620_v43 }
  0x37   :  { %1286 = vmatpush3.bf16.msra.mxu0 %v1620_v43 }
  0x38   :  { %1190 = vmatpush3.bf16.msra.mxu1 %v1620_v43  ;;  %1288 = vmatprep.subr.bf16.mxu0 %v1287_v4 }
  0x39   :  { %1192 = vmatprep.subr.bf16.mxu1 %v1191_v5 }
  0x95   :  { %v51_v38 = vpop.permute.xlu0 %50 }
  0x96   :  { %vm55_vm0 = vcmp.eq.s32.totalorder %v1672_v37, %v51_v38 }
  0x97   :  { %v833_v51 = vsel %vm55_vm0, 1.0, %v1458_v50 }
  0x98   :  { %v143_v6 = vsub.f32 %v833_v51, %v833_v51 }
  0x99   :  { %v1677_v10 = vpop.permute.xlu0 %53 }
  0x9a   :  { %vm56_vm1 = vcmp.eq.s32.totalorder %v1672_v37, %v1677_v10  ;;  %v144_v26 = vand.u32 4294901760, %v143_v6 }
  0x9b   :  { %v834_v1 = vsel %vm56_vm1, 1.0, %v1458_v50 }
  0x9c   :  { %v1684_v27 = vsub.f32 %v834_v1, %v834_v1  ;;  %1086 = vmatprep.mubr.f32.mxu0 %v144_v26  ;;  %v145_v47 = vsub.f32 %v143_v6, %v144_v26 }
  0x9e   :  { %v146_v48 = vand.u32 4294901760, %v145_v47  ;;  %v154_v54 = vand.u32 4294901760, %v1684_v27 }
  0xa0   :  { %981 = vmatprep.mubr.f32.mxu1 %v146_v48  ;;  %1087 = vmatmul.mubr.f32.vlgmr.msra.gmra.mrb[0].mxu0 %v154_v54  ;;  %v155_v59 = vsub.f32 %v1684_v27, %v154_v54 }
  0xa1   :  { %1290 = vmatpush3.bf16.msra.mxu0 %v1287_v4  ;;  %1121 = vmatprep.mubr.msk.f32.mxu0 %vm55_vm0, %v1459_v60 }
  0xa2   :  { %1292 = vmatprep.subr.bf16.mxu0 %v1537_v33  ;;  %v156_v0 = vand.u32 4294901760, %v155_v59 }
  0xa4   :  { %982 = vmatmul.mubr.f32.vlgmr.msra.gmra.mrb[0].mxu1 %v156_v0 }
  0xa5   :  { %1194 = vmatpush3.bf16.msra.mxu1 %v1191_v5  ;;  %1294 = vmatpush3.bf16.msra.mxu0 %v1537_v33 }
  0xa6   :  { %1016 = vmatprep.mubr.msk.f32.mxu1 %vm55_vm0, %v1459_v60  ;;  %1196 = vmatprep.subr.bf16.mxu1 %v1563_v49 }
  0xa7   :  { %1296 = vmatprep.subr.bf16.mxu0 %v1570_v53 }
  0xa9   :  { %1198 = vmatpush3.bf16.msra.mxu1 %v1563_v49  ;;  %1298 = vmatpush3.bf16.msra.mxu0 %v1570_v53 }
  0xaa   :  { %1200 = vmatprep.subr.bf16.mxu1 %v1594_v9  ;;  %1300 = vmatprep.subr.bf16.mxu0 %v1587_v3 }
  0xad   :  { %1202 = vmatpush3.bf16.msra.mxu1 %v1594_v9  ;;  %1302 = vmatpush3.bf16.msra.mxu0 %v1587_v3 }
  0xae   :  { %1204 = vmatprep.subr.bf16.mxu1 %v1608_v22  ;;  %1304 = vmatprep.subr.bf16.mxu0 %v1613_v29 }
  0xb1   :  { %1206 = vmatpush3.bf16.msra.mxu1 %v1608_v22  ;;  %1306 = vmatpush3.bf16.msra.mxu0 %v1613_v29  ;;  %v769_v29 = vpop.permute.xlu0 %768 }
  0xb2   :  { %1208 = vmatprep.subr.bf16.mxu1 %v1625_v55  ;;  %1308 = vmatprep.subr.bf16.mxu0 %v1622_v40  ;;  %vm773_vm2 = vcmp.eq.s32.totalorder %v1672_v37, %v769_v29 }
  0xb5   :  { %1210 = vmatpush3.bf16.msra.mxu1 %v1625_v55  ;;  %1310 = vmatpush3.bf16.msra.mxu0 %v1622_v40 }
  0xb6   :  { %1212 = vmatprep.subr.bf16.mxu1 %v1632_v15  ;;  %1312 = vmatprep.subr.bf16.mxu0 %v1635_v57 }
  0xb9   :  { %1214 = vmatpush3.bf16.msra.mxu1 %v1632_v15  ;;  %1314 = vmatpush3.bf16.msra.mxu0 %v1635_v57 }
  0xba   :  { %1216 = vmatprep.subr.bf16.mxu1 %v1641_v34  ;;  %1316 = vmatprep.subr.bf16.mxu0 %v1639_v63 }
  0xbd   :  { %1218 = vmatpush3.bf16.msra.mxu1 %v1641_v34  ;;  %1318 = vmatpush3.bf16.msra.mxu0 %v1639_v63 }
  0xbe   :  { %1220 = vmatprep.subr.bf16.mxu1 %v1643_v8  ;;  %1320 = vmatprep.subr.bf16.mxu0 %v1508_v13 }
  0xc0   :  { %1122 = vmatmul.mubr.msk.f32.vlgmr.msra.gmra.mrb[0].mxu0 %vm56_vm1, %v1459_v60 }
  0xc1   :  { %1222 = vmatpush3.bf16.msra.mxu1 %v1643_v8  ;;  %1322 = vmatpush3.bf16.msra.mxu0 %v1508_v13 }
  0xc2   :  { %1156 = vmatprep.mubr.msk.f32.mxu0 %vm55_vm0, %v1459_v60  ;;  %1224 = vmatprep.subr.bf16.mxu1 %v1647_v11 }
  0xc3   :  { %1324 = vmatprep.subr.bf16.mxu0 %v1510_v14 }
  0xc4   :  { %1017 = vmatmul.mubr.msk.f32.vlgmr.msra.gmra.mrb[0].mxu1 %vm56_vm1, %v1459_v60 }
  0xc5   :  { %1226 = vmatpush3.bf16.msra.mxu1 %v1647_v11  ;;  %1051 = vmatprep.mubr.f32.mxu1 %v143_v6 }
  0xc6   :  { %1326 = vmatpush3.bf16.msra.mxu0 %v1510_v14  ;;  %1228 = vmatprep.subr.bf16.mxu1 %v1651_v35 }
  0xc7   :  { %1328 = vmatprep.subr.bf16.mxu0 %v1519_v19 }
  0xc9   :  { %1230 = vmatpush3.bf16.msra.mxu1 %v1651_v35 }
  0xca   :  { %1330 = vmatpush3.bf16.msra.mxu0 %v1519_v19  ;;  %1232 = vmatprep.subr.bf16.mxu1 %v1655_v42 }
  0xcb   :  { %1332 = vmatprep.subr.bf16.mxu0 %v1533_v31 }
  0xcd   :  { %1234 = vmatpush3.bf16.msra.mxu1 %v1655_v42 }
  0xce   :  { %1334 = vmatpush3.bf16.msra.mxu0 %v1533_v31  ;;  %1236 = vmatprep.subr.bf16.mxu1 %v1659_v28 }
  0xcf   :  { %1336 = vmatprep.subr.bf16.mxu0 %v1548_v39 }
  0xd1   :  { %1238 = vmatpush3.bf16.msra.mxu1 %v1659_v28 }
  0xd2   :  { %1338 = vmatpush3.bf16.msra.mxu0 %v1548_v39  ;;  %1240 = vmatprep.subr.bf16.mxu1 %v1663_v36 }
  0xd3   :  { %1340 = vmatprep.subr.bf16.mxu0 %v1576_v56 }
  0xd5   :  { %1242 = vmatpush3.bf16.msra.mxu1 %v1663_v36 }
  0xd6   :  { %1342 = vmatpush3.bf16.msra.mxu0 %v1576_v56  ;;  %1244 = vmatprep.subr.bf16.mxu1 %v1665_v32 }
  0xd7   :  { %1344 = vmatprep.subr.bf16.mxu0 %v1603_v17 }
  0xd9   :  { %1246 = vmatpush3.bf16.msra.mxu1 %v1665_v32 }
  0xda   :  { %1346 = vmatpush3.bf16.msra.mxu0 %v1603_v17  ;;  %1248 = vmatprep.subr.bf16.mxu1 %v1667_v45 }
  0xdb   :  { %1348 = vmatprep.subr.bf16.mxu0 %v1620_v43 }
  0xdd   :  { %1250 = vmatpush3.bf16.msra.mxu1 %v1667_v45 }
  0xde   :  { %1350 = vmatpush3.bf16.msra.mxu0 %v1620_v43  ;;  %1252 = vmatprep.subr.bf16.mxu1 %v1669_v46 }
  0xe1   :  { %1157 = vmatmul.mubr.msk.f32.vlgmr.msra.gmra.mrb[0].mxu0 %vm56_vm1, %v1459_v60  ;;  %1254 = vmatpush3.bf16.msra.mxu1 %v1669_v46 }
  0xe4   :  { %1052 = vmatmul.mubr.f32.vlgmr.msra.gmra.mrb[0].mxu1 %v1684_v27 }
 0x1b4   :  { %v1158_v13 = vpop.f32.mrb[0].mxu0 }
 0x1b5   :  { %v735_v14 = vpop.f32.mrb[1].mxu0 }
 0x1b7   :  { %v1053_v19 = vpop.f32.mrb[0].mxu1 }
 0x1b8   :  { %v1351_v31 = vadd.f32 %v1158_v13, %v1053_v19  ;;  %v419_v33 = vpop.f32.mrb[1].mxu1 }
 0x1b9   :  { %v1352_v39 = vadd.f32 %v735_v14, %v419_v33 }
 0x1ba   :  { %746 = vst [vmem:[#allocation5 + $0x8] sm:$0xff] %v1351_v31  ;;  %749 = vmax.xlane.f32.xlu1 %v1351_v31 }
 0x1bb   :  { %745 = vst [vmem:[#allocation5] sm:$0xff] %v1352_v39  ;;  %v775_v55 = vsel %vm773_vm2, %v1352_v39, 0.0 }
 0x1be   :  { %747 = vmax.xlane.f32.xlu1 %v1352_v39 }
 0x1cf   :  { %771 = vperm.xlu1 %1372, %v1506_v7  }
 0x247   :  { %v750_v49 = vpop.xlane.xlu1 %749 }
 0x248   :  { %v752_v53 = vsub.f32 %v1351_v31, %v750_v49 }
 0x24a   :  { %v755_v56 = vmul.f32 1.442695, %v752_v53 }
 0x24b   :  { %v748_v3 = vpop.xlane.xlu1 %747 }
 0x24c   :  { %1373 = vpow2.f32 %v755_v56  ;;  %v751_v9 = vsub.f32 %v1352_v39, %v748_v3 }
 0x24e   :  { %v753_v17 = vmul.f32 1.442695, %v751_v9 }
 0x24f   :  { %v772_v40 = vpop.permute.xlu1 %771 }
 0x250   :  { %1375 = vpow2.f32 %v753_v17  ;;  %vm774_vm3 = vcmp.eq.s32.totalorder %v1672_v37, %v772_v40 }
 0x251   :  { %v776_v7 = vsel %vm774_vm3, %v1351_v31, 0.0 }
 0x256   :  { %v1374_v22 = vpop.eup %1373 }
 0x257   :  { %759 = vadd.xlane.f32.xlu1 %v1374_v22 }
 0x25a   :  { %v1376_v43 = vpop.eup %1375 }
 0x25b   :  { %757 = vadd.xlane.f32.xlu0 %v1376_v43 }
 0x25f   :  { %777 = vadd.xlane.f32.xlu0 %v775_v55 }
 0x263   :  { %779 = vadd.xlane.f32.xlu0 %v776_v7 }
 0x264   :  { %1414 = shalt.err (!%p1411_p12)
}
 0x265   :  { %s1415_s6 = scalar_lea.hbm %s1802_s2, 256 }
 0x266   :  { %p1416_p13 = scmp.ne.s32.totalorder %s1802_s2, %s1415_s6  ;;  %p1419_p0 = scmp.lt.u32.totalorder %s1415_s6, %s1802_s2 }
 0x268   :  { %p1421_p1 = pnand %p1419_p0, %p1416_p13 }
 0x26a   :  { %1424 = shalt.err (!%p1421_p1)
}
 0x26b   :  { %813 = dma.vmem_to_hbm [thread:$0]  %s808_s1, 256, %s1802_s2, [#allocation4], %s1454_s22, %s1454_s22, %s1455_s23  }
 0x26c   :  { %s1461_s2 = smov [#allocation6]  }
 0x26d   :  { %s820_s13 = sshll.u32 %s1461_s2, 4  ;;  %s821_s13 = int_to_ptr.vmem [resolvable:$true] %s820_s13 }
 0x26e   :  { %s1425_s14 = scalar_lea.vmem %s821_s13, 16  ;;  %s1429_s15 = scalar_lea.vmem %s821_s13, 32 }
 0x26f   :  { %p1426_p2 = scmp.ne.s32.totalorder %s821_s13, %s1425_s14  ;;  %p1430_p3 = scmp.lt.s32.totalorder %s821_s13, %s821_s13 }
 0x270   :  { %p1431_p4 = scmp.lt.s32.totalorder %s1429_s15, %s1425_s14 }
 0x272   :  { %p1432_p5 = por %p1431_p4, %p1430_p3 }
 0x274   :  { %p1433_p6 = pnand %p1432_p5, %p1426_p2 }
 0x2e4   :  { %v760_v2 = vpop.xlane.xlu1 %759 }
 0x2e5   :  { %1377 = vlog2.f32 %v760_v2 }
 0x2e8   :  { %v758_v4 = vpop.xlane.xlu0 %757 }
 0x2e9   :  { %1379 = vlog2.f32 %v758_v4 }
 0x2ec   :  { %v778_v15 = vpop.xlane.xlu0 %777 }
 0x2ef   :  { %v1378_v5 = vpop.eup %1377 }
 0x2f0   :  { %v764_v12 = vmul.f32 0.6931472, %v1378_v5  ;;  %v780_v16 = vpop.xlane.xlu0 %779 }
 0x2f2   :  { %v766_v44 = vadd.f32 %v764_v12, %v750_v49 }
 0x2f3   :  { %v1380_v41 = vpop.eup %1379 }
 0x2f4   :  { %v762_v52 = vmul.f32 0.6931472, %v1380_v41  ;;  %v791_v20 = vsub.f32 %v766_v44, %v780_v16 }
 0x2f6   :  { %v765_v57 = vadd.f32 %v762_v52, %v748_v3 }
 0x2f8   :  { %v790_v18 = vsub.f32 %v765_v57, %v778_v15 }
 0x2fa   :  { %v794_v21 = vadd.f32 %v791_v20, %v790_v18 }
 0x2fc   :  { %v795_v62 = vrot.slane %v794_v21, 4 }
 0x2fe   :  { %v796_v63 = vadd.f32 %v795_v62, %v794_v21 }
 0x300   :  { %v797_v23 = vrot.slane %v796_v63, 2 }
 0x302   :  { %v798_v30 = vadd.f32 %v797_v23, %v796_v63 }
 0x304   :  { %v799_v34 = vrot.slane %v798_v30, 1 }
 0x306   :  { %v800_v58 = vadd.f32 %v799_v34, %v798_v30 }
 0x308   :  { %801 = vst [vmem:[#allocation6] sm:$0x1] %v800_v58 }
 0x309   :  { %1436 = shalt.err (!%p1433_p6)
}
 0x30a   :  { %s1437_s18 = scalar_lea.hbm %s1803_s3, 16 }
 0x30b   :  { %p1438_p7 = scmp.ne.s32.totalorder %s1803_s3, %s1437_s18  ;;  %p1441_p8 = scmp.lt.u32.totalorder %s1437_s18, %s1803_s3 }
 0x30d   :  { %p1443_p9 = pnand %p1441_p8, %p1438_p7 }
 0x30f   :  { %1446 = shalt.err (!%p1443_p9)
}
 0x310   :  { %823 = dma.vmem_to_hbm [thread:$0]  %s821_s13, 16, %s1803_s3, [#allocation7]  }
 0x311   :  { %1449 = dma.done.wait [#allocation4], 256  }
 0x312   :  { %1450 = vsyncadd [#allocation4], 4294967040 }
 0x313   :  { %1451 = dma.done.wait [#allocation7], 16  }
 0x314   :  { %1452 = vsyncadd [#allocation7], 4294967280 }
 0x315   :  { %830 = vsyncpa [#allocation3], 1 }
 0x316   :  { %831 = vsyncpa [#allocation4], 1 }
 0x317   :  { %832 = vsyncpa [#allocation7], 1 }

</bundles_post_ra>
